<compile_context>
chip_gen: v7x
topology: tpu7x:2x2x1
jax: 0.10.0
libtpu: 0.0.40
codegen_flags: <defaults>
</compile_context>

<pallas_src>
import functools

import jax
import jax.numpy as jnp
from jax.experimental import pallas as pl
from jax.experimental.pallas import tpu as pltpu


LANES = 128
SUBLANES = 8


def _cdiv(a, b):
    return -(-a // b)


def _chip_defaults():
    """Generation-aware defaults: (tile_rows, num_shards, input_buffer_count)."""
    kind = ""
    try:
        kind = jax.devices()[0].device_kind.lower()
    except Exception:  # pragma: no cover - defensive
        pass
    is_v5 = "v5" in kind
    is_v7 = ("v7" in kind) or ("7x" in kind)
    tile_rows = 2048 if is_v5 else 4096      # v5e: stay well inside 16 MiB scoped VMEM
    num_shards = 2 if is_v7 else 1           # only v7x has 2 TensorCores per chip
    buffer_count = 3 if is_v5 else 2         # deeper input buffering on HBM-bound v5e
    return tile_rows, num_shards, buffer_count


def _pointwise_terms(x, t, *, gamma, gamma_is_int, binary_target):
    """Elementwise (focal_term, sigmoid(x), t) shared by kernel and JAX tail.

    bce here is exactly the reference  x - x*t + max(-x,0) + log(e^{-mv}+e^{-x-mv})
    rewritten as  max(x,0) - x*t + log(1 + exp(-|x|)), reusing exp(-|x|) for the
    sigmoid as well (one exp, one divide, one log per element).
    """
    x = x.astype(jnp.float32)
    t = t.astype(jnp.float32)
    e = jnp.exp(-jnp.abs(x))
    one_plus_e = 1.0 + e
    inv = 1.0 / one_plus_e
    sig = jnp.where(x >= 0.0, inv, e * inv)            # sigmoid(x)
    bce = jnp.maximum(x, 0.0) - x * t + jnp.log(one_plus_e)
    if binary_target:
        # Exact for t in {0,1}:  sigmoid(x*(1-2t)) == sig + t - 2*t*sig  (no 2nd sigmoid)
        p = sig + t - 2.0 * t * sig
    else:
        p = jax.nn.sigmoid(x * (1.0 - 2.0 * t))
    if gamma_is_int:
        w = p ** int(gamma)                             # lax.integer_pow -> pure VPU
    else:
        w = jnp.exp(gamma * jnp.log(jnp.maximum(p, jnp.finfo(jnp.float32).tiny)))
    return w * bce, sig, t


def _mixed_loss_tile_kernel(x_ref, t_ref, out_ref, *, gamma, gamma_is_int,
                            binary_target, sub_rows, n_full, rem_rows):
    j = pl.program_id(1)                                # tile axis ("arbitrary")

    @pl.when(j == 0)
    def _init():
        out_ref[...] = jnp.zeros_like(out_ref)

    def fold(v, nrows):
        # (nrows, 128) -> (8, 128): layout-preserving reshape + VPU adds only.
        return v.reshape(nrows // SUBLANES, SUBLANES, LANES).sum(axis=0)

    def chunk_sums(row0, nrows):
        x = x_ref[pl.ds(row0, nrows), :]
        t = t_ref[pl.ds(row0, nrows), :]
        focal, sig, tt = _pointwise_terms(
            x, t, gamma=gamma, gamma_is_int=gamma_is_int,
            binary_target=binary_target)
        return (fold(focal, nrows), fold(sig * tt, nrows),
                fold(sig, nrows), fold(tt, nrows))

    if n_full == 1 and rem_rows == 0:
        acc = chunk_sums(0, sub_rows)                   # small-tile fast path
    else:
        zero = jnp.zeros((SUBLANES, LANES), jnp.float32)
        acc = (zero, zero, zero, zero)
        if n_full > 0:
            def body(i, carry):
                row0 = pl.multiple_of(i * sub_rows, sub_rows)
                c = chunk_sums(row0, sub_rows)
                return tuple(a + b for a, b in zip(carry, c))
            acc = jax.lax.fori_loop(0, n_full, body, acc, unroll=True)
        if rem_rows > 0:
            c = chunk_sums(n_full * sub_rows, rem_rows)
            acc = tuple(a + b for a, b in zip(acc, c))

    out_ref[0, 0] += acc[0]   # sum focal elementwise loss
    out_ref[0, 1] += acc[1]   # sum sigmoid(x) * t   (dice intersection)
    out_ref[0, 2] += acc[2]   # sum sigmoid(x)
    out_ref[0, 3] += acc[3]   # sum t


def mixed_loss(x, t, *, alpha, gamma, tile_rows=None, num_shards=None,
               sub_rows=256, assume_binary_target=False):
    """alpha * FocalLoss(gamma)(x, t) - log(dice_loss(x, t)) (MixedLoss.forward)."""
    if x.shape != t.shape:
        raise ValueError("Target size must be the same as input size")
    n = int(x.size)
    gamma = float(gamma)
    gamma_is_int = gamma.is_integer() and gamma >= 0.0

    d_tile, d_shards, buffer_count = _chip_defaults()
    if tile_rows is None:
        tile_rows = d_tile
    if num_shards is None:
        num_shards = d_shards

    x_flat = jnp.ravel(x)
    t_flat = jnp.ravel(t)

    rows_full = n // LANES                      # complete 128-lane rows of real data
    rows8 = (rows_full // SUBLANES) * SUBLANES  # sublane-aligned rows for the kernel

    kernel_sums = jnp.zeros((4,), jnp.float32)
    kernel_rows = 0

    if rows8 >= SUBLANES:
        tile_rows = max(SUBLANES, min(int(tile_rows), rows8))
        tile_rows -= tile_rows % SUBLANES
        n_tiles = rows8 // tile_rows
        num_shards = max(1, min(int(num_shards), n_tiles))
        tiles_per_shard = n_tiles // num_shards          # exact split, no clamping
        kernel_rows = num_shards * tiles_per_shard * tile_rows

        sub = max(SUBLANES, min(int(sub_rows), tile_rows))
        sub -= sub % SUBLANES
        n_full = tile_rows // sub
        rem_rows = tile_rows - n_full * sub

        pad = (-n) % LANES
        if pad:
            # Only when numel isn't a multiple of 128: a <128-element pad (one copy,
            # unavoidable without 1-D DMA gymnastics).  The padded garbage row is
            # never addressed by the kernel (kernel_rows <= rows_full).
            x2d = jnp.pad(x_flat, (0, pad)).reshape(-1, LANES)
            t2d = jnp.pad(t_flat, (0, pad)).reshape(-1, LANES)
        else:
            x2d = x_flat.reshape(-1, LANES)              # pure bitcast, no copy
            t2d = t_flat.reshape(-1, LANES)

        def in_index(c, j):
            return (c * tiles_per_shard + j, 0)

        spec_kwargs = {}
        if buffer_count != 2:
            spec_kwargs = dict(pipeline_mode=pl.Buffered(buffer_count))
        in_spec = pl.BlockSpec((tile_rows, LANES), in_index, **spec_kwargs)
        out_spec = pl.BlockSpec((1, 4, SUBLANES, LANES), lambda c, j: (c, 0, 0, 0))

        kernel = functools.partial(
            _mixed_loss_tile_kernel,
            gamma=gamma,
            gamma_is_int=gamma_is_int,
            binary_target=bool(assume_binary_target),
            sub_rows=sub,
            n_full=n_full,
            rem_rows=rem_rows,
        )

        n_k = kernel_rows * LANES
        cost = pl.CostEstimate(
            flops=20 * n_k,
            transcendentals=(3 if assume_binary_target else 5) * n_k,
            bytes_accessed=n_k * (x.dtype.itemsize + t.dtype.itemsize)
            + num_shards * 4 * SUBLANES * LANES * 4,
        )

        partial_sums = pl.pallas_call(
            kernel,
            out_shape=jax.ShapeDtypeStruct(
                (num_shards, 4, SUBLANES, LANES), jnp.float32),
            grid_spec=pltpu.PrefetchScalarGridSpec(
                num_scalar_prefetch=0,
                grid=(num_shards, tiles_per_shard),
                in_specs=[in_spec, in_spec],
                out_specs=out_spec,
            ),
            # TODO(synk): promote shard axis to pltpu.CORE_PARALLEL on v7x once
            # dual-TensorCore occupancy is verified in xprof.
            compiler_params=pltpu.CompilerParams(
                dimension_semantics=("parallel", "arbitrary")),
            cost_estimate=cost,
        )(x2d, t2d)
        kernel_sums = partial_sums.sum(axis=(0, 2, 3))

    # Plain-JAX tail: rows not covered by the kernel grid plus the sub-128
    # remainder.  Constant-bounded (< num_shards*tile_rows rows + 127 elems).
    tail_start = kernel_rows * LANES
    if tail_start < n:
        focal, sig, tt = _pointwise_terms(
            x_flat[tail_start:], t_flat[tail_start:],
            gamma=gamma, gamma_is_int=gamma_is_int,
            binary_target=bool(assume_binary_target))
        kernel_sums = kernel_sums + jnp.stack(
            [jnp.sum(focal), jnp.sum(sig * tt), jnp.sum(sig), jnp.sum(tt)])

    focal_sum, intersection, sig_sum, t_sum = (
        kernel_sums[0], kernel_sums[1], kernel_sums[2], kernel_sums[3])
    focal_mean = focal_sum / jnp.float32(n)
    smooth = jnp.float32(1.0)
    dice = (2.0 * intersection + smooth) / (sig_sum + t_sum + smooth)
    # loss.mean() over a scalar is the scalar itself.
    return alpha * focal_mean - jnp.log(dice)


def _mixed_loss_ref(x, t, *, alpha, gamma):
    x = x.astype(jnp.float32)
    t = t.astype(jnp.float32)
    max_val = jnp.maximum(-x, 0.0)
    bce = x - x * t + max_val + jnp.log(jnp.exp(-max_val) + jnp.exp(-x - max_val))
    invprobs = jax.nn.log_sigmoid(-x * (t * 2.0 - 1.0))
    focal = jnp.mean(jnp.exp(invprobs * gamma) * bce)
    sig = jax.nn.sigmoid(x)
    inter = jnp.sum(sig * t)
    dice = (2.0 * inter + 1.0) / (jnp.sum(sig) + jnp.sum(t) + 1.0)
    return alpha * focal - jnp.log(dice)


if __name__ == "__main__":
    # Deterministic "parameters" of the module (its __init__ args).
    alpha = 10.0
    gamma = 2.0

    key = jax.random.PRNGKey(0)
    k1, k2 = jax.random.split(key)
    # Small NCHW logits and binary mask target, as a segmentation loss expects.
    x = jax.random.normal(k1, (2, 4, 16, 16), jnp.float32)
    t = (jax.random.uniform(k2, (2, 4, 16, 16)) > 0.5).astype(jnp.float32)

    ref = jax.block_until_ready(_mixed_loss_ref(x, t, alpha=alpha, gamma=gamma))

    # General-target path (exact module semantics for arbitrary/soft targets).
    loss = jax.block_until_ready(mixed_loss(x, t, alpha=alpha, gamma=gamma))
    assert jnp.allclose(loss, ref, rtol=1e-5, atol=1e-5), (loss, ref)

    # Binary-target fast path (exact for 0/1 masks; drops one sigmoid/element).
    loss_bin = jax.block_until_ready(
        mixed_loss(x, t, alpha=alpha, gamma=gamma, assume_binary_target=True))
    assert jnp.allclose(loss_bin, ref, rtol=1e-5, atol=1e-5), (loss_bin, ref)

    print("KERNEL_OK")
</pallas_src>

<mosaic_0001>
module attributes {stable_mosaic.version = 11 : i64} {
  func.func @_mixed_loss_tile_kernel(%arg0: i32, %arg1: i32, %arg2: memref<16x128xf32, #tpu.memory_space<vmem>>, %arg3: memref<16x128xf32, #tpu.memory_space<vmem>>, %arg4: memref<1x4x8x128xf32, #tpu.memory_space<vmem>>) attributes {dimension_semantics = [#tpu.dimension_semantics<parallel>, #tpu.dimension_semantics<arbitrary>], iteration_bounds = array<i64: 1, 1>, scalar_prefetch = 0 : i64, scratch_operands = 0 : i64, tpu.core_type = #tpu.core_type<tc>, window_params = [{transform_indices = @transform_0, window_bounds = array<i64: 16, 128>}, {transform_indices = @transform_1, window_bounds = array<i64: 16, 128>}, {transform_indices = @transform_2, window_bounds = array<i64: 1, 4, 8, 128>}]} {
    %c0_i32 = arith.constant 0 : i32
    %0 = arith.cmpi eq, %arg1, %c0_i32 : i32
    %1 = arith.extui %0 : i1 to i32
    %c0_i32_0 = arith.constant 0 : i32
    %2 = arith.cmpi ne, %1, %c0_i32_0 : i32
    scf.if %2 {
      %cst_44 = arith.constant 0.000000e+00 : f32
      %68 = vector.broadcast %cst_44 : f32 to vector<1x4x8x128xf32>
      %c0_45 = arith.constant 0 : index
      %c0_46 = arith.constant 0 : index
      %c0_47 = arith.constant 0 : index
      %c0_48 = arith.constant 0 : index
      %69 = vector.load %arg4[%c0_45, %c0_46, %c0_47, %c0_48] : memref<1x4x8x128xf32, #tpu.memory_space<vmem>>, vector<1x4x8x128xf32>
      tpu.vector_store %arg4[%c0_45, %c0_46, %c0_47, %c0_48], %68 {strides = array<i32>} : memref<1x4x8x128xf32, #tpu.memory_space<vmem>>, vector<1x4x8x128xf32>,
    } else {
    }
    %c0 = arith.constant 0 : index
    %c0_1 = arith.constant 0 : index
    %3 = vector.load %arg2[%c0, %c0_1] : memref<16x128xf32, #tpu.memory_space<vmem>>, vector<16x128xf32>
    %c0_2 = arith.constant 0 : index
    %c0_3 = arith.constant 0 : index
    %4 = vector.load %arg3[%c0_2, %c0_3] : memref<16x128xf32, #tpu.memory_space<vmem>>, vector<16x128xf32>
    %5 = math.absf %3 : vector<16x128xf32>
    %cst = arith.constant 0.000000e+00 : f32
    %6 = vector.broadcast %cst : f32 to vector<16x128xf32>
    %7 = arith.subf %6, %5 : vector<16x128xf32>
    %8 = math.exp %7 : vector<16x128xf32>
    %cst_4 = arith.constant 1.000000e+00 : f32
    %9 = vector.broadcast %cst_4 : f32 to vector<16x128xf32>
    %10 = arith.addf %9, %8 : vector<16x128xf32>
    %cst_5 = arith.constant 1.000000e+00 : f32
    %11 = vector.broadcast %cst_5 : f32 to vector<16x128xf32>
    %12 = arith.divf %11, %10 : vector<16x128xf32>
    %cst_6 = arith.constant 0.000000e+00 : f32
    %13 = vector.broadcast %cst_6 : f32 to vector<16x128xf32>
    %14 = arith.cmpf oge, %3, %13 : vector<16x128xf32>
    %15 = arith.mulf %8, %12 : vector<16x128xf32>
    %16 = arith.select %14, %12, %15 : vector<16x128xi1>, vector<16x128xf32>
    %cst_7 = arith.constant 0.000000e+00 : f32
    %17 = vector.broadcast %cst_7 : f32 to vector<16x128xf32>
    %18 = arith.maximumf %3, %17 : vector<16x128xf32>
    %19 = arith.mulf %3, %4 : vector<16x128xf32>
    %20 = arith.subf %18, %19 : vector<16x128xf32>
    %21 = math.log %10 : vector<16x128xf32>
    %22 = arith.addf %20, %21 : vector<16x128xf32>
    %cst_8 = arith.constant 2.000000e+00 : f32
    %23 = vector.broadcast %cst_8 : f32 to vector<16x128xf32>
    %24 = arith.mulf %23, %4 : vector<16x128xf32>
    %cst_9 = arith.constant 1.000000e+00 : f32
    %25 = vector.broadcast %cst_9 : f32 to vector<16x128xf32>
    %26 = arith.subf %25, %24 : vector<16x128xf32>
    %27 = arith.mulf %3, %26 : vector<16x128xf32>
    %28 = arith.negf %27 : vector<16x128xf32>
    %29 = math.exp %28 : vector<16x128xf32>
    %cst_10 = arith.constant 1.000000e+00 : f32
    %30 = vector.broadcast %cst_10 : f32 to vector<16x128xf32>
    %31 = arith.addf %30, %29 : vector<16x128xf32>
    %32 = arith.divf %30, %31 : vector<16x128xf32>
    %33 = arith.mulf %32, %32 : vector<16x128xf32>
    %34 = arith.mulf %33, %22 : vector<16x128xf32>
    %35 = vector.shape_cast %34 : vector<16x128xf32> to vector<2x8x128xf32>
    %cst_11 = arith.constant dense<0.000000e+00> : vector<8x128xf32>
    %36 = vector.multi_reduction <add>, %35, %cst_11 [0] : vector<2x8x128xf32> to vector<8x128xf32>
    %37 = arith.mulf %16, %4 : vector<16x128xf32>
    %38 = vector.shape_cast %37 : vector<16x128xf32> to vector<2x8x128xf32>
    %cst_12 = arith.constant dense<0.000000e+00> : vector<8x128xf32>
    %39 = vector.multi_reduction <add>, %38, %cst_12 [0] : vector<2x8x128xf32> to vector<8x128xf32>
    %40 = vector.shape_cast %16 : vector<16x128xf32> to vector<2x8x128xf32>
    %cst_13 = arith.constant dense<0.000000e+00> : vector<8x128xf32>
    %41 = vector.multi_reduction <add>, %40, %cst_13 [0] : vector<2x8x128xf32> to vector<8x128xf32>
    %42 = vector.shape_cast %4 : vector<16x128xf32> to vector<2x8x128xf32>
    %cst_14 = arith.constant dense<0.000000e+00> : vector<8x128xf32>
    %43 = vector.multi_reduction <add>, %42, %cst_14 [0] : vector<2x8x128xf32> to vector<8x128xf32>
    %c0_15 = arith.constant 0 : index
    %c0_16 = arith.constant 0 : index
    %c0_17 = arith.constant 0 : index
    %c0_18 = arith.constant 0 : index
    %44 = vector.load %arg4[%c0_15, %c0_16, %c0_17, %c0_18] : memref<1x4x8x128xf32, #tpu.memory_space<vmem>>, vector<1x1x8x128xf32>
    %45 = vector.shape_cast %44 : vector<1x1x8x128xf32> to vector<8x128xf32>
    %46 = arith.addf %45, %36 : vector<8x128xf32>
    %c0_19 = arith.constant 0 : index
    %c0_20 = arith.constant 0 : index
    %c0_21 = arith.constant 0 : index
    %c0_22 = arith.constant 0 : index
    %47 = vector.load %arg4[%c0_19, %c0_20, %c0_21, %c0_22] : memref<1x4x8x128xf32, #tpu.memory_space<vmem>>, vector<1x1x8x128xf32>
    %48 = vector.shape_cast %47 : vector<1x1x8x128xf32> to vector<8x128xf32>
    %49 = vector.shape_cast %46 : vector<8x128xf32> to vector<1x1x8x128xf32>
    tpu.vector_store %arg4[%c0_19, %c0_20, %c0_21, %c0_22], %49 {strides = array<i32>} : memref<1x4x8x128xf32, #tpu.memory_space<vmem>>, vector<1x1x8x128xf32>,
    %c0_23 = arith.constant 0 : index
    %c1 = arith.constant 1 : index
    %c0_24 = arith.constant 0 : index
    %c0_25 = arith.constant 0 : index
    %50 = vector.load %arg4[%c0_23, %c1, %c0_24, %c0_25] : memref<1x4x8x128xf32, #tpu.memory_space<vmem>>, vector<1x1x8x128xf32>
    %51 = vector.shape_cast %50 : vector<1x1x8x128xf32> to vector<8x128xf32>
    %52 = arith.addf %51, %39 : vector<8x128xf32>
    %c0_26 = arith.constant 0 : index
    %c1_27 = arith.constant 1 : index
    %c0_28 = arith.constant 0 : index
    %c0_29 = arith.constant 0 : index
    %53 = vector.load %arg4[%c0_26, %c1_27, %c0_28, %c0_29] : memref<1x4x8x128xf32, #tpu.memory_space<vmem>>, vector<1x1x8x128xf32>
    %54 = vector.shape_cast %53 : vector<1x1x8x128xf32> to vector<8x128xf32>
    %55 = vector.shape_cast %52 : vector<8x128xf32> to vector<1x1x8x128xf32>
    tpu.vector_store %arg4[%c0_26, %c1_27, %c0_28, %c0_29], %55 {strides = array<i32>} : memref<1x4x8x128xf32, #tpu.memory_space<vmem>>, vector<1x1x8x128xf32>,
    %c0_30 = arith.constant 0 : index
    %c2 = arith.constant 2 : index
    %c0_31 = arith.constant 0 : index
    %c0_32 = arith.constant 0 : index
    %56 = vector.load %arg4[%c0_30, %c2, %c0_31, %c0_32] : memref<1x4x8x128xf32, #tpu.memory_space<vmem>>, vector<1x1x8x128xf32>
    %57 = vector.shape_cast %56 : vector<1x1x8x128xf32> to vector<8x128xf32>
    %58 = arith.addf %57, %41 : vector<8x128xf32>
    %c0_33 = arith.constant 0 : index
    %c2_34 = arith.constant 2 : index
    %c0_35 = arith.constant 0 : index
    %c0_36 = arith.constant 0 : index
    %59 = vector.load %arg4[%c0_33, %c2_34, %c0_35, %c0_36] : memref<1x4x8x128xf32, #tpu.memory_space<vmem>>, vector<1x1x8x128xf32>
    %60 = vector.shape_cast %59 : vector<1x1x8x128xf32> to vector<8x128xf32>
    %61 = vector.shape_cast %58 : vector<8x128xf32> to vector<1x1x8x128xf32>
    tpu.vector_store %arg4[%c0_33, %c2_34, %c0_35, %c0_36], %61 {strides = array<i32>} : memref<1x4x8x128xf32, #tpu.memory_space<vmem>>, vector<1x1x8x128xf32>,
    %c0_37 = arith.constant 0 : index
    %c3 = arith.constant 3 : index
    %c0_38 = arith.constant 0 : index
    %c0_39 = arith.constant 0 : index
    %62 = vector.load %arg4[%c0_37, %c3, %c0_38, %c0_39] : memref<1x4x8x128xf32, #tpu.memory_space<vmem>>, vector<1x1x8x128xf32>
    %63 = vector.shape_cast %62 : vector<1x1x8x128xf32> to vector<8x128xf32>
    %64 = arith.addf %63, %43 : vector<8x128xf32>
    %c0_40 = arith.constant 0 : index
    %c3_41 = arith.constant 3 : index
    %c0_42 = arith.constant 0 : index
    %c0_43 = arith.constant 0 : index
    %65 = vector.load %arg4[%c0_40, %c3_41, %c0_42, %c0_43] : memref<1x4x8x128xf32, #tpu.memory_space<vmem>>, vector<1x1x8x128xf32>
    %66 = vector.shape_cast %65 : vector<1x1x8x128xf32> to vector<8x128xf32>
    %67 = vector.shape_cast %64 : vector<8x128xf32> to vector<1x1x8x128xf32>
    tpu.vector_store %arg4[%c0_40, %c3_41, %c0_42, %c0_43], %67 {strides = array<i32>} : memref<1x4x8x128xf32, #tpu.memory_space<vmem>>, vector<1x1x8x128xf32>,
    return
  }
  func.func @transform_0(%arg0: i32, %arg1: i32) -> (i32, i32) {
    %c1_i32 = arith.constant 1 : i32
    %0 = arith.muli %arg0, %c1_i32 : i32
    %1 = arith.addi %0, %arg1 : i32
    %c0_i32 = arith.constant 0 : i32
    %c0_i32_0 = arith.constant 0 : i32
    return %1, %c0_i32 : i32, i32
  }
  func.func @transform_1(%arg0: i32, %arg1: i32) -> (i32, i32) {
    %c1_i32 = arith.constant 1 : i32
    %0 = arith.muli %arg0, %c1_i32 : i32
    %1 = arith.addi %0, %arg1 : i32
    %c0_i32 = arith.constant 0 : i32
    %c0_i32_0 = arith.constant 0 : i32
    return %1, %c0_i32 : i32, i32
  }
  func.func @transform_2(%arg0: i32, %arg1: i32) -> (i32, i32, i32, i32) {
    %c0_i32 = arith.constant 0 : i32
    %c0_i32_0 = arith.constant 0 : i32
    %c0_i32_1 = arith.constant 0 : i32
    %c0_i32_2 = arith.constant 0 : i32
    return %arg0, %c0_i32, %c0_i32_0, %c0_i32_1 : i32, i32, i32, i32
  }
}

</mosaic_0001>

<bundles_post_ra>
// kernel: tpu_custom_call.1
= control target key start
LH: loop header
LB: loop body
LE: loop exit
PB: predicated region body
PF: predicated region fallthrough
CT: control target
= control target key end

     0   :  { %7 = vsyncpa [#allocation3], 0  ;;  %s322_s0 = inlined_call_operand.hbm [shape: f32[16,128], index: 0, kind: input, shape index: {}]   ;;  %s323_s1 = inlined_call_operand.hbm [shape: f32[16,128], index: 1, kind: input, shape index: {}]   ;;  %s324_s2 = inlined_call_operand.hbm [shape: f32[1,4,8,128], index: 2, kind: output, shape index: {}]  }
   0x1   :  { %8 = vsyncpa [#allocation6], 0 }
   0x2   :  { %9 = vsyncpa [#allocation4], 0  ;;  %s257_s9 = smov [#allocation2]   ;;  %s185_s13 = scalar_lea.hbm %s322_s0, 256 }
   0x3   :  { %s19_s10 = sshll.u32 %s257_s9, 4  ;;  %p186_p0 = scmp.ne.s32.totalorder %s322_s0, %s185_s13  ;;  %s20_s10 = int_to_ptr.vmem [resolvable:$true] %s19_s10 }
   0x4   :  { %p189_p1 = scmp.lt.u32.totalorder %s185_s13, %s322_s0 }
   0x6   :  { %p191_p2 = pnand %p189_p1, %p186_p0 }
   0x8   :  { %194 = shalt.err (!%p191_p2)
}
   0x9   :  { %s195_s18 = scalar_lea.vmem %s20_s10, 256  ;;  %p200_p4 = scmp.lt.s32.totalorder %s20_s10, %s20_s10 }
   0xa   :  { %p196_p3 = scmp.ne.s32.totalorder %s20_s10, %s195_s18  ;;  %p201_p5 = scmp.lt.s32.totalorder %s195_s18, %s195_s18 }
   0xc   :  { %p202_p6 = por %p201_p5, %p200_p4 }
   0xe   :  { %p203_p7 = pnand %p202_p6, %p196_p3 }
  0x10   :  { %206 = shalt.err (!%p203_p7)
}
  0x11   :  { %s258_s19 = smov 128   ;;  %s259_s20 = smov 8  }
  0x12   :  { %25 = dma.hbm_to_vmem [thread:$0]  %s322_s0, 256, %s20_s10, [#allocation3], %s258_s19, %s258_s19, %s259_s20  }
  0x13   :  { %s260_s23 = smov [#allocation5]   ;;  %s207_s27 = scalar_lea.hbm %s323_s1, 256 }
  0x14   :  { %s35_s24 = sshll.u32 %s260_s23, 4  ;;  %p208_p8 = scmp.ne.s32.totalorder %s323_s1, %s207_s27  ;;  %s36_s24 = int_to_ptr.vmem [resolvable:$true] %s35_s24 }
  0x15   :  { %p211_p9 = scmp.lt.u32.totalorder %s207_s27, %s323_s1 }
  0x17   :  { %p213_p10 = pnand %p211_p9, %p208_p8 }
  0x19   :  { %216 = shalt.err (!%p213_p10)
}
  0x1a   :  { %s217_s4 = scalar_lea.vmem %s36_s24, 256  ;;  %p222_p12 = scmp.lt.s32.totalorder %s36_s24, %s36_s24 }
  0x1b   :  { %p218_p11 = scmp.ne.s32.totalorder %s36_s24, %s217_s4  ;;  %p223_p13 = scmp.lt.s32.totalorder %s217_s4, %s217_s4 }
  0x1d   :  { %p224_p0 = por %p223_p13, %p222_p12 }
  0x1f   :  { %p225_p1 = pnand %p224_p0, %p218_p11 }
  0x21   :  { %228 = shalt.err (!%p225_p1)
}
  0x22   :  { %41 = dma.hbm_to_vmem [thread:$0]  %s323_s1, 256, %s36_s24, [#allocation6], %s258_s19, %s258_s19, %s259_s20  }
  0x23   :  { %251 = dma.done.wait [#allocation3], 256  }
  0x24   :  { %252 = vsyncadd [#allocation3], 4294967040 }
  0x25   :  { %253 = dma.done.wait [#allocation6], 256  }
  0x26   :  { %254 = vsyncadd [#allocation6], 4294967040  ;;  %v60_v0 = vld [vmem:[#allocation2] sm:$0xff]  ;;  %v61_v1 = vld [vmem:[#allocation2 + $0x8] sm:$0xff]  ;;  %s261_s1 = smov [#allocation7]  }
  0x27   :  { %v62_v2 = vld [vmem:[#allocation5] sm:$0xff]  ;;  %v63_v3 = vld [vmem:[#allocation5 + $0x8] sm:$0xff]  ;;  %v64_v4 = vand.u32 2147483647, %v60_v0  ;;  %v65_v5 = vand.u32 2147483647, %v61_v1 }
  0x28   :  { %v96_v6 = vmul.f32 2.0, %v62_v2  ;;  %v97_v7 = vmul.f32 2.0, %v63_v3  ;;  %v123_v14 = vadd.f32 %v63_v3, %v62_v2  ;;  %v84_v27 = vmax.f32 %v60_v0, 0.0  ;;  %s144_s6 = sshll.u32 %s261_s1, 4  ;;  %s145_s6 = int_to_ptr.vmem [resolvable:$true] %s144_s6 }
  0x29   :  { %v66_v8 = vsub.f32 0.0, %v64_v4  ;;  %v67_v9 = vsub.f32 0.0, %v65_v5  ;;  %v86_v28 = vmul.f32 %v62_v2, %v60_v0  ;;  %v85_v29 = vmax.f32 %v61_v1, 0.0  ;;  %s229_s7 = scalar_lea.vmem %s145_s6, 512  ;;  %p234_p3 = scmp.lt.s32.totalorder %s145_s6, %s145_s6 }
  0x2a   :  { %v98_v10 = vsub.f32 1.0, %v96_v6  ;;  %v99_v11 = vsub.f32 1.0, %v97_v7  ;;  %138 = vst [vmem:[#allocation7 + $0x18] sm:$0xff] %v123_v14  ;;  %v87_v30 = vmul.f32 %v63_v3, %v61_v1  ;;  %vm78_vm0 = vcmp.ge.f32.partialorder %v60_v0, 0.0  ;;  %p230_p2 = scmp.ne.s32.totalorder %s145_s6, %s229_s7  ;;  %p235_p4 = scmp.lt.s32.totalorder %s229_s7, %s229_s7 }
  0x2b   :  { %v68_v12 = vmul.f32 1.442695, %v66_v8  ;;  %v70_v13 = vmul.f32 1.442695, %v67_v9  ;;  %v88_v33 = vsub.f32 %v84_v27, %v86_v28  ;;  %vm79_vm1 = vcmp.ge.f32.partialorder %v61_v1, 0.0 }
  0x2c   :  { %v100_v15 = vmul.f32 %v98_v10, %v60_v0  ;;  %v101_v16 = vmul.f32 %v99_v11, %v61_v1  ;;  %v89_v36 = vsub.f32 %v85_v29, %v87_v30  ;;  %p236_p5 = por %p235_p4, %p234_p3 }
  0x2d   :  { %165 = vpow2.f32 %v68_v12 }
  0x2e   :  { %167 = vpow2.f32 %v70_v13  ;;  %v157_v17 = vmul.f32 -1.442695, %v100_v15  ;;  %v158_v18 = vmul.f32 -1.442695, %v101_v16  ;;  %p237_p6 = pnand %p236_p5, %p230_p2 }
  0x30   :  { %169 = vpow2.f32 %v157_v17 }
  0x31   :  { %171 = vpow2.f32 %v158_v18 }
  0x37   :  { %v166_v19 = vpop.eup %165 }
  0x38   :  { %v168_v20 = vpop.eup %167  ;;  %v72_v21 = vadd.f32 1.0, %v166_v19 }
  0x39   :  { %v73_v22 = vadd.f32 1.0, %v168_v20 }
  0x3a   :  { %v170_v23 = vpop.eup %169  ;;  %173 = vrcp.f32 %v72_v21 }
  0x3b   :  { %v172_v24 = vpop.eup %171  ;;  %175 = vrcp.f32 %v73_v22  ;;  %v108_v25 = vadd.f32 1.0, %v170_v23 }
  0x3c   :  { %177 = vlog2.f32 %v72_v21  ;;  %v109_v26 = vadd.f32 1.0, %v172_v24 }
  0x3d   :  { %179 = vlog2.f32 %v73_v22 }
  0x3e   :  { %181 = vrcp.f32 %v108_v25 }
  0x3f   :  { %183 = vrcp.f32 %v109_v26 }
  0x44   :  { %v174_v31 = vpop.eup %173 }
  0x45   :  { %v176_v32 = vpop.eup %175  ;;  %v80_v34 = vmul.f32 %v174_v31, %v166_v19 }
  0x46   :  { %v178_v35 = vpop.eup %177  ;;  %v81_v37 = vmul.f32 %v176_v32, %v168_v20 }
  0x47   :  { %v180_v38 = vpop.eup %179  ;;  %v91_v39 = vmul.f32 0.6931472, %v178_v35  ;;  %v82_v40 = vsel %vm78_vm0, %v174_v31, %v80_v34 }
  0x48   :  { %v182_v41 = vpop.eup %181  ;;  %v93_v42 = vmul.f32 0.6931472, %v180_v38  ;;  %v83_v43 = vsel %vm79_vm1, %v176_v32, %v81_v37  ;;  %v119_v44 = vmul.f32 %v82_v40, %v62_v2 }
  0x49   :  { %v184_v45 = vpop.eup %183  ;;  %v94_v46 = vadd.f32 %v91_v39, %v88_v33  ;;  %v114_v47 = vmul.f32 %v182_v41, %v182_v41  ;;  %v120_v48 = vmul.f32 %v83_v43, %v63_v3  ;;  %v122_v49 = vadd.f32 %v83_v43, %v82_v40 }
  0x4a   :  { %v95_v50 = vadd.f32 %v93_v42, %v89_v36  ;;  %v115_v51 = vmul.f32 %v184_v45, %v184_v45 }
  0x4b   :  { %v116_v52 = vmul.f32 %v114_v47, %v94_v46  ;;  %v121_v53 = vadd.f32 %v120_v48, %v119_v44  ;;  %134 = vst [vmem:[#allocation7 + $0x10] sm:$0xff] %v122_v49 }
  0x4c   :  { %v117_v54 = vmul.f32 %v115_v51, %v95_v50 }
  0x4d   :  { %130 = vst [vmem:[#allocation7 + $0x8] sm:$0xff] %v121_v53 }
  0x4e   :  { %v118_v55 = vadd.f32 %v117_v54, %v116_v52 }
  0x50   :  { %126 = vst [vmem:[#allocation7] sm:$0xff] %v118_v55 }
  0x51   :  { %240 = shalt.err (!%p237_p6)
}
  0x52   :  { %s241_s10 = scalar_lea.hbm %s324_s2, 512 }
  0x53   :  { %p242_p7 = scmp.ne.s32.totalorder %s324_s2, %s241_s10  ;;  %p245_p8 = scmp.lt.u32.totalorder %s241_s10, %s324_s2 }
  0x55   :  { %p247_p9 = pnand %p245_p8, %p242_p7 }
  0x57   :  { %250 = shalt.err (!%p247_p9)
}
  0x58   :  { %150 = dma.vmem_to_hbm [thread:$0]  %s145_s6, 512, %s324_s2, [#allocation4], %s258_s19, %s258_s19, %s259_s20  }
  0x59   :  { %255 = dma.done.wait [#allocation4], 512  }
  0x5a   :  { %256 = vsyncadd [#allocation4], 4294966784 }
  0x5b   :  { %154 = vsyncpa [#allocation3], 1 }
  0x5c   :  { %155 = vsyncpa [#allocation6], 1 }
  0x5d   :  { %156 = vsyncpa [#allocation4], 1 }

</bundles_post_ra>
